<compile_context>
chip_gen: v6e
topology: v6e:2x2x1
jax: 0.10.0
libtpu: 0.0.40
codegen_flags: <defaults>
</compile_context>

<pallas_src>
import jax
import jax.numpy as jnp
from jax.experimental import pallas as pl
from jax.experimental.pallas import tpu as pltpu


LANE = 128          # f32 lane width
TILE_B_CAP = 512    # batch rows (on lanes) processed per grid step


def _round_up(n, m):
    return ((n + m - 1) // m) * m


def predictor_kernel(scalars_ref,                       # SMEM: [slope, b3]
                     xt_ref, w1_ref, b1_ref, w2_ref, b2_ref, w3_ref,
                     out_ref):
    # Transposed formulation: batch on lanes, features on sublanes, so every
    # intermediate and the final store are lane-dense.
    xt = xt_ref[...]                                                    # (D, TB)

    # fc1 + relu : (D, D) @ (D, TB) -> (D, TB)
    h1 = jnp.dot(w1_ref[...], xt, preferred_element_type=jnp.float32) + b1_ref[...]
    h1 = jnp.maximum(h1, 0.0)

    # fc2 + relu : (H, D) @ (D, TB) -> (H, TB)
    h2 = jnp.dot(w2_ref[...], h1, preferred_element_type=jnp.float32) + b2_ref[...]
    h2 = jnp.maximum(h2, 0.0)

    # fc3 as VPU multiply + sublane (XLU) reduction -> (1, TB); avoids the
    # N=1 MXU matmul and the (H, 1)-tile-wasting operand layout.
    h3 = jnp.sum(h2 * w3_ref[...], axis=0, keepdims=True)

    slope = scalars_ref[0]
    b3 = scalars_ref[1]
    out_ref[...] = jax.nn.sigmoid(slope * (h3 + b3))


def predictor_forward(x, slope, params, *, tile_b_cap=TILE_B_CAP):
    """x: (B, D) f32, slope: scalar, params: torch.nn.Linear-layout weights."""
    B, D = x.shape
    H = D // 2
    w1, b1, w2, b2, w3, b3 = (params["w1"], params["b1"], params["w2"],
                              params["b2"], params["w3"], params["b3"])

    tile_b = min(tile_b_cap, _round_up(B, LANE))
    b_pad = _round_up(B, tile_b)
    n_tiles = b_pad // tile_b

    # Layout plumbing only: put batch on lanes (lane-dense x tiles / output).
    xt = jnp.pad(x, ((0, b_pad - B), (0, 0))).T                 # (D, B_pad)

    scalars = jnp.stack([jnp.asarray(slope, jnp.float32).reshape(()),
                         jnp.asarray(b3, jnp.float32).reshape(())])

    smem = pl.BlockSpec(memory_space=pltpu.MemorySpace.SMEM)
    resident = lambda shape: pl.BlockSpec(shape, lambda i: (0, 0))

    out = pl.pallas_call(
        predictor_kernel,
        out_shape=jax.ShapeDtypeStruct((1, b_pad), jnp.float32),
        grid=(n_tiles,),
        in_specs=[
            smem,                                             # [slope, b3]
            pl.BlockSpec((D, tile_b), lambda i: (0, i)),      # x^T tile
            resident((D, D)),                                 # w1 (out, in)
            resident((D, 1)),                                 # b1
            resident((H, D)),                                 # w2 (out, in)
            resident((H, 1)),                                 # b2
            resident((H, 1)),                                 # w3^T
        ],
        out_specs=pl.BlockSpec((1, tile_b), lambda i: (0, i)),
        compiler_params=pltpu.CompilerParams(
            dimension_semantics=("parallel",)),
    )(scalars, xt, w1, b1, w2, b2, w3)

    p = out[0, :B].reshape(B, 1)
    # round() in the wrapper (XLA fuses it); keeps kernel stores lane-dense.
    p_bin = jnp.round(p)
    return p, p_bin


def init_params(key, input_dim):
    """Deterministic synthetic parameters, torch.nn.Linear layout (out, in);
    fc3 weight kept as a (H, 1) column for the in-kernel VPU reduction."""
    D = input_dim
    H = D // 2
    k1, k2, k3, k4, k5, k6 = jax.random.split(key, 6)
    s1 = 1.0 / jnp.sqrt(D)
    s2 = 1.0 / jnp.sqrt(D)
    s3 = 1.0 / jnp.sqrt(H)
    return {
        "w1": jax.random.uniform(k1, (D, D), jnp.float32, -s1, s1),
        "b1": jax.random.uniform(k2, (D, 1), jnp.float32, -s1, s1),
        "w2": jax.random.uniform(k3, (H, D), jnp.float32, -s2, s2),
        "b2": jax.random.uniform(k4, (H, 1), jnp.float32, -s2, s2),
        "w3": jax.random.uniform(k5, (H, 1), jnp.float32, -s3, s3),  # fc3 W^T
        "b3": jax.random.uniform(k6, (1, 1), jnp.float32, -s3, s3),
    }


def predictor_reference(x, slope, params):
    """Pure-JAX reference for correctness checking."""
    h1 = jax.nn.relu(x @ params["w1"].T + params["b1"].reshape(1, -1))
    h2 = jax.nn.relu(h1 @ params["w2"].T + params["b2"].reshape(1, -1))
    h3 = h2 @ params["w3"] + params["b3"]
    p = jax.nn.sigmoid(slope * h3)
    return p, jnp.round(p)


if __name__ == "__main__":
    key = jax.random.PRNGKey(0)
    kx, kp = jax.random.split(key)

    B, D = 8, 32           # batch=8, input_dim=32
    slope = 5.0

    x = jax.random.normal(kx, (B, D), jnp.float32)
    params = init_params(kp, D)

    out, out_bin = predictor_forward(x, slope, params)
    out = jax.block_until_ready(out)
    out_bin = jax.block_until_ready(out_bin)

    ref_out, ref_bin = predictor_reference(x, slope, params)
    assert out.shape == (B, 1) and out_bin.shape == (B, 1)
    assert jnp.allclose(out, ref_out, atol=1e-5, rtol=1e-5)
    assert jnp.allclose(out_bin, ref_bin)

    print("KERNEL_OK")
</pallas_src>

<mosaic_0001>
module attributes {stable_mosaic.version = 11 : i64} {
  func.func @predictor_kernel(%arg0: i32, %arg1: memref<2xf32, #tpu.memory_space<smem>>, %arg2: memref<32x128xf32, #tpu.memory_space<vmem>>, %arg3: memref<32x32xf32, #tpu.memory_space<vmem>>, %arg4: memref<32x1xf32, #tpu.memory_space<vmem>>, %arg5: memref<16x32xf32, #tpu.memory_space<vmem>>, %arg6: memref<16x1xf32, #tpu.memory_space<vmem>>, %arg7: memref<16x1xf32, #tpu.memory_space<vmem>>, %arg8: memref<1x128xf32, #tpu.memory_space<vmem>>) attributes {dimension_semantics = [#tpu.dimension_semantics<parallel>], iteration_bounds = array<i64: 1>, scalar_prefetch = 0 : i64, scratch_operands = 0 : i64, tpu.core_type = #tpu.core_type<tc>, window_params = [{transform_indices = @transform_0, window_bounds = array<i64: 2>}, {transform_indices = @transform_1, window_bounds = array<i64: 32, 128>}, {pipeline_mode = #tpu.pipeline_mode<synchronous>, transform_indices = @transform_2, window_bounds = array<i64: 32, 32>}, {pipeline_mode = #tpu.pipeline_mode<synchronous>, transform_indices = @transform_3, window_bounds = array<i64: 32, 1>}, {pipeline_mode = #tpu.pipeline_mode<synchronous>, transform_indices = @transform_4, window_bounds = array<i64: 16, 32>}, {pipeline_mode = #tpu.pipeline_mode<synchronous>, transform_indices = @transform_5, window_bounds = array<i64: 16, 1>}, {pipeline_mode = #tpu.pipeline_mode<synchronous>, transform_indices = @transform_6, window_bounds = array<i64: 16, 1>}, {transform_indices = @transform_7, window_bounds = array<i64: 1, 128>}]} {
    %c0 = arith.constant 0 : index
    %c0_0 = arith.constant 0 : index
    %0 = vector.load %arg2[%c0, %c0_0] : memref<32x128xf32, #tpu.memory_space<vmem>>, vector<32x128xf32>
    %c0_1 = arith.constant 0 : index
    %c0_2 = arith.constant 0 : index
    %1 = vector.load %arg3[%c0_1, %c0_2] : memref<32x32xf32, #tpu.memory_space<vmem>>, vector<32x32xf32>
    %cst = arith.constant dense<0.000000e+00> : vector<32x128xf32>
    %2 = tpu.matmul %1, %0, %cst {dimension_numbers = #tpu.dot_dimension_numbers<[1], [0], [0], [1], [0, 0, 1, 1], [], []>} : vector<32x32xf32>, vector<32x128xf32>, vector<32x128xf32> -> vector<32x128xf32>
    %c0_3 = arith.constant 0 : index
    %c0_4 = arith.constant 0 : index
    %3 = vector.load %arg4[%c0_3, %c0_4] : memref<32x1xf32, #tpu.memory_space<vmem>>, vector<32x1xf32>
    %4 = vector.broadcast %3 : vector<32x1xf32> to vector<32x128xf32>
    %5 = arith.addf %2, %4 : vector<32x128xf32>
    %cst_5 = arith.constant 0.000000e+00 : f32
    %6 = vector.broadcast %cst_5 : f32 to vector<32x128xf32>
    %7 = arith.maximumf %5, %6 : vector<32x128xf32>
    %c0_6 = arith.constant 0 : index
    %c0_7 = arith.constant 0 : index
    %8 = vector.load %arg5[%c0_6, %c0_7] : memref<16x32xf32, #tpu.memory_space<vmem>>, vector<16x32xf32>
    %cst_8 = arith.constant dense<0.000000e+00> : vector<16x128xf32>
    %9 = tpu.matmul %8, %7, %cst_8 {dimension_numbers = #tpu.dot_dimension_numbers<[1], [0], [0], [1], [0, 0, 1, 1], [], []>} : vector<16x32xf32>, vector<32x128xf32>, vector<16x128xf32> -> vector<16x128xf32>
    %c0_9 = arith.constant 0 : index
    %c0_10 = arith.constant 0 : index
    %10 = vector.load %arg6[%c0_9, %c0_10] : memref<16x1xf32, #tpu.memory_space<vmem>>, vector<16x1xf32>
    %11 = vector.broadcast %10 : vector<16x1xf32> to vector<16x128xf32>
    %12 = arith.addf %9, %11 : vector<16x128xf32>
    %cst_11 = arith.constant 0.000000e+00 : f32
    %13 = vector.broadcast %cst_11 : f32 to vector<16x128xf32>
    %14 = arith.maximumf %12, %13 : vector<16x128xf32>
    %c0_12 = arith.constant 0 : index
    %c0_13 = arith.constant 0 : index
    %15 = vector.load %arg7[%c0_12, %c0_13] : memref<16x1xf32, #tpu.memory_space<vmem>>, vector<16x1xf32>
    %16 = vector.broadcast %15 : vector<16x1xf32> to vector<16x128xf32>
    %17 = arith.mulf %14, %16 : vector<16x128xf32>
    %cst_14 = arith.constant dense<0.000000e+00> : vector<128xf32>
    %18 = vector.multi_reduction <add>, %17, %cst_14 [0] : vector<16x128xf32> to vector<128xf32>
    %19 = vector.shape_cast %18 : vector<128xf32> to vector<1x128xf32>
    %c0_15 = arith.constant 0 : index
    %20 = memref.load %arg1[%c0_15] : memref<2xf32, #tpu.memory_space<smem>>
    %c1 = arith.constant 1 : index
    %21 = memref.load %arg1[%c1] : memref<2xf32, #tpu.memory_space<smem>>
    %22 = vector.broadcast %21 : f32 to vector<1x128xf32>
    %23 = arith.addf %19, %22 : vector<1x128xf32>
    %24 = vector.broadcast %20 : f32 to vector<1x128xf32>
    %25 = arith.mulf %24, %23 : vector<1x128xf32>
    %26 = arith.negf %25 : vector<1x128xf32>
    %27 = math.exp %26 : vector<1x128xf32>
    %cst_16 = arith.constant 1.000000e+00 : f32
    %28 = vector.broadcast %cst_16 : f32 to vector<1x128xf32>
    %29 = arith.addf %28, %27 : vector<1x128xf32>
    %30 = arith.divf %28, %29 : vector<1x128xf32>
    %c0_17 = arith.constant 0 : index
    %c0_18 = arith.constant 0 : index
    %31 = vector.load %arg8[%c0_17, %c0_18] : memref<1x128xf32, #tpu.memory_space<vmem>>, vector<1x128xf32>
    tpu.vector_store %arg8[%c0_17, %c0_18], %30 {strides = array<i32>} : memref<1x128xf32, #tpu.memory_space<vmem>>, vector<1x128xf32>,
    return
  }
  func.func @transform_0(%arg0: i32) -> i32 {
    %c0_i32 = arith.constant 0 : i32
    %c0_i32_0 = arith.constant 0 : i32
    return %c0_i32 : i32
  }
  func.func @transform_1(%arg0: i32) -> (i32, i32) {
    %c0_i32 = arith.constant 0 : i32
    %c0_i32_0 = arith.constant 0 : i32
    return %c0_i32, %arg0 : i32, i32
  }
  func.func @transform_2(%arg0: i32) -> (i32, i32) {
    %c0_i32 = arith.constant 0 : i32
    %c0_i32_0 = arith.constant 0 : i32
    %c0_i32_1 = arith.constant 0 : i32
    return %c0_i32, %c0_i32_0 : i32, i32
  }
  func.func @transform_3(%arg0: i32) -> (i32, i32) {
    %c0_i32 = arith.constant 0 : i32
    %c0_i32_0 = arith.constant 0 : i32
    %c0_i32_1 = arith.constant 0 : i32
    return %c0_i32, %c0_i32_0 : i32, i32
  }
  func.func @transform_4(%arg0: i32) -> (i32, i32) {
    %c0_i32 = arith.constant 0 : i32
    %c0_i32_0 = arith.constant 0 : i32
    %c0_i32_1 = arith.constant 0 : i32
    return %c0_i32, %c0_i32_0 : i32, i32
  }
  func.func @transform_5(%arg0: i32) -> (i32, i32) {
    %c0_i32 = arith.constant 0 : i32
    %c0_i32_0 = arith.constant 0 : i32
    %c0_i32_1 = arith.constant 0 : i32
    return %c0_i32, %c0_i32_0 : i32, i32
  }
  func.func @transform_6(%arg0: i32) -> (i32, i32) {
    %c0_i32 = arith.constant 0 : i32
    %c0_i32_0 = arith.constant 0 : i32
    %c0_i32_1 = arith.constant 0 : i32
    return %c0_i32, %c0_i32_0 : i32, i32
  }
  func.func @transform_7(%arg0: i32) -> (i32, i32) {
    %c0_i32 = arith.constant 0 : i32
    %c0_i32_0 = arith.constant 0 : i32
    return %c0_i32, %arg0 : i32, i32
  }
}

</mosaic_0001>

<bundles_post_ra>
// kernel: tpu_custom_call.1
= control target key start
LH: loop header
LB: loop body
LE: loop exit
PB: predicated region body
PF: predicated region fallthrough
CT: control target
= control target key end

     0   :  { %12 = vsyncpa [#allocation5], 0  ;;  %s561_s0 = inlined_call_operand.vmem [shape: f32[2], index: 0, kind: input, shape index: {}]   ;;  %s562_s1 = inlined_call_operand.vmem [shape: f32[32,128], index: 1, kind: input, shape index: {}]   ;;  %s563_s2 = inlined_call_operand.vmem [shape: f32[32,32], index: 2, kind: input, shape index: {}]   ;;  %s564_s3 = inlined_call_operand.vmem [shape: f32[32,1], index: 3, kind: input, shape index: {}]   ;;  %s565_s4 = inlined_call_operand.hbm [shape: f32[16,32], index: 4, kind: input, shape index: {}]   ;;  %s566_s5 = inlined_call_operand.vmem [shape: f32[16,1], index: 5, kind: input, shape index: {}]   ;;  %s567_s6 = inlined_call_operand.vmem [shape: f32[16,1], index: 6, kind: input, shape index: {}]   ;;  %s568_s7 = inlined_call_operand.hbm [shape: f32[1,128], index: 7, kind: output, shape index: {}]  }
   0x1   :  { %13 = vsyncpa [#allocation3], 0 }
   0x2   :  { %14 = vsyncpa [#allocation4], 0  ;;  %s21_s26 = sshll.u32 %s561_s0, 4  ;;  %s22_s26 = int_to_ptr.vmem [resolvable:$true] %s21_s26 }
   0x3   :  { %s394_s27 = scalar_lea.vmem %s22_s26, 16  ;;  %p399_p1 = scmp.lt.s32.totalorder %s22_s26, %s22_s26 }
   0x4   :  { %p395_p0 = scmp.ne.s32.totalorder %s22_s26, %s394_s27  ;;  %p400_p2 = scmp.lt.s32.totalorder %s394_s27, %s394_s27 }
   0x6   :  { %p401_p3 = por %p400_p2, %p399_p1 }
   0x8   :  { %p402_p4 = pnand %p401_p3, %p395_p0 }
   0xa   :  { %405 = shalt.err (!%p402_p4)
}
   0xb   :  { %s452_s28 = smov [#allocation2]   ;;  %s453_s29 = smov [#allocation6]  }
   0xc   :  { %24 = dma.vmem_to_smem %s22_s26, 16, %s452_s28, [#allocation5]  }
   0xd   :  { %s36_s30 = sshll.u32 %s453_s29, 4  ;;  %s37_s30 = int_to_ptr.vmem [resolvable:$true] %s36_s30 }
   0xe   :  { %s414_s8 = scalar_lea.vmem %s37_s30, 256  ;;  %p419_p6 = scmp.lt.s32.totalorder %s37_s30, %s37_s30 }
   0xf   :  { %p415_p5 = scmp.ne.s32.totalorder %s37_s30, %s414_s8  ;;  %p420_p7 = scmp.lt.s32.totalorder %s414_s8, %s414_s8 }
  0x11   :  { %p421_p8 = por %p420_p7, %p419_p6 }
  0x13   :  { %p422_p9 = pnand %p421_p8, %p415_p5 }
  0x15   :  { %425 = shalt.err (!%p422_p9)
}
  0x16   :  { %s454_s0 = smov 128   ;;  %s455_s9 = smov 8  }
  0x17   :  { %42 = dma.hbm_to_vmem [thread:$0]  %s565_s4, 256, %s37_s30, [#allocation3], %s454_s0, %s454_s0, %s455_s9  }
  0x18   :  { %446 = dma.done.wait [#allocation5], 16  }
  0x19   :  { %447 = vsyncadd [#allocation5], 4294967280 }
  0x1a   :  { %448 = dma.done.wait [#allocation3], 256  }
  0x1b   :  { %449 = vsyncadd [#allocation3], 4294967040 }
  0x1c   :  { %53 = sfence }
  0x1d   :  { %v57_v0 = vld [vmem:[%s562_s1 + $0x18] sm:$0xff]  ;;  %v56_v1 = vld [vmem:[%s562_s1 + $0x10] sm:$0xff]  ;;  %vm86_vm0 = vcmask 261120   ;;  %v58_v2 = vld [vmem:[%s563_s2] sm:$0xff]  ;;  %v456_v3 = vmov 0  }
  0x1e   :  { %357 = vmatprep.subr.mxu0 %v57_v0  ;;  %388 = vset.pattern.permute.xlu0 %v456_v3  ;;  %v55_v4 = vld [vmem:[%s562_s1 + $0x8] sm:$0xff]  ;;  %v65_v5 = vld [vmem:[%s564_s3 + $0x18] sm:$0xff]  ;;  %v54_v7 = vld [vmem:[%s562_s1] sm:$0xff] }
  0x1f   :  { %358 = vmatpush3.msra.mxu0 %v57_v0  ;;  %365 = vmatprep.mubr.msk.f32.mxu0 %vm86_vm0, %v58_v2  ;;  %v63_v6 = vld [vmem:[%s564_s3 + $0x8] sm:$0xff]  ;;  %v64_v8 = vld [vmem:[%s564_s3 + $0x10] sm:$0xff]  ;;  %v62_v10 = vld [vmem:[%s564_s3] sm:$0xff] }
  0x20   :  { %359 = vmatprep.subr.mxu0 %v56_v1  ;;  %83 = vperm.xlu0 %388, %v65_v5   ;;  %v59_v9 = vld [vmem:[%s563_s2 + $0x8] sm:$0xff]  ;;  %v60_v11 = vld [vmem:[%s563_s2 + $0x10] sm:$0xff]  ;;  %v190_v12 = vld [vmem:[%s566_s5] sm:$0xff] }
  0x21   :  { %360 = vmatpush3.msra.mxu0 %v56_v1  ;;  %389 = vset.pattern.permute.xlu1 %v456_v3  ;;  %v61_v13 = vld [vmem:[%s563_s2 + $0x18] sm:$0xff]  ;;  %v191_v14 = vld [vmem:[%s566_s5 + $0x8] sm:$0xff]  ;;  %v285_v15 = vld [vmem:[%s567_s6] sm:$0xff]  ;;  %s341_s2 = sld [smem:[#allocation2 + $0x1]] }
  0x22   :  { %361 = vmatprep.subr.mxu0 %v55_v4  ;;  %73 = vperm.xlu1 %389, %v63_v6   ;;  %v286_v16 = vld [vmem:[%s567_s6 + $0x8] sm:$0xff]  ;;  %v188_v17 = vld [vmem:[#allocation6] sm:$0xff]  ;;  %s306_s5 = sld [smem:[#allocation2]]  ;;  %s457_s6 = smov [#allocation7]  }
  0x23   :  { %362 = vmatpush3.msra.mxu0 %v55_v4  ;;  %379 = vmatprep.mubr.msk.f32.mxu1 %vm86_vm0, %v188_v17  ;;  %v189_v34 = vld [vmem:[#allocation6 + $0x8] sm:$0xff]  ;;  %s325_s17 = sshll.u32 %s457_s6, 4  ;;  %s326_s17 = int_to_ptr.vmem [resolvable:$true] %s325_s17 }
  0x24   :  { %363 = vmatprep.subr.mxu0 %v54_v7  ;;  %78 = vperm.xlu0 %388, %v64_v8   ;;  %s426_s4 = scalar_lea.vmem %s326_s17, 16  ;;  %s430_s18 = scalar_lea.vmem %s326_s17, 32 }
  0x25   :  { %364 = vmatpush3.msra.mxu0 %v54_v7  ;;  %p427_p10 = scmp.ne.s32.totalorder %s326_s17, %s426_s4  ;;  %p431_p11 = scmp.lt.s32.totalorder %s326_s17, %s326_s17 }
  0x26   :  { %366 = vmatmul.mubr.msk.f32.vlgmr.msra.gmra.mxu0 %vm86_vm0, %v59_v9  ;;  %68 = vperm.xlu1 %389, %v62_v10   ;;  %p432_p12 = scmp.lt.s32.totalorder %s430_s18, %s426_s4 }
  0x27   :  { %368 = vmatprep.mubr.msk.f32.mxu0 %vm86_vm0, %v60_v11  ;;  %v308_v53 = vstv %s341_s2 }
  0x28   :  { %194 = vperm.xlu0 %388, %v190_v12   ;;  %v310_v55 = vstv %s306_s5  ;;  %p433_p13 = por %p432_p12, %p431_p11 }
  0x2a   :  { %369 = vmatmul.mubr.msk.f32.gmra.mxu0 %vm86_vm0, %v61_v13  ;;  %199 = vperm.xlu1 %389, %v191_v14   ;;  %p434_p0 = pnand %p433_p13, %p427_p10 }
  0x2c   :  { %289 = vperm.xlu0 %388, %v285_v15  }
  0x2e   :  { %294 = vperm.xlu1 %389, %v286_v16  }
  0x9b   :  { %v84_v18 = vpop.permute.xlu0 %83 }
  0x9d   :  { %v74_v20 = vpop.permute.xlu1 %73 }
  0x9f   :  { %v79_v24 = vpop.permute.xlu0 %78 }
  0xa1   :  { %v69_v29 = vpop.permute.xlu1 %68 }
  0xa3   :  { %v195_v35 = vpop.permute.xlu0 %194 }
  0xa5   :  { %v200_v36 = vpop.permute.xlu1 %199 }
  0xa7   :  { %v290_v43 = vpop.permute.xlu0 %289 }
  0xa9   :  { %v295_v44 = vpop.permute.xlu1 %294 }
  0xe6   :  { %v367_v19 = vpop.f32.mrf.mxu0 }
  0xe7   :  { %v171_v26 = vadd.f32 %v367_v19, %v74_v20 }
  0xe8   :  { %v165_v21 = vpop.f32.mrf.mxu0 }
  0xe9   :  { %v166_v30 = vadd.f32 %v165_v21, %v69_v29  ;;  %v185_v32 = vmax.f32 %v171_v26, 0.0 }
  0xea   :  { %v370_v22 = vpop.f32.mrf.mxu0 }
  0xeb   :  { %v181_v23 = vadd.f32 %v370_v22, %v84_v18  ;;  %v184_v33 = vmax.f32 %v166_v30, 0.0 }
  0xec   :  { %v175_v25 = vpop.f32.mrf.mxu0 }
  0xed   :  { %v187_v27 = vmax.f32 %v181_v23, 0.0  ;;  %v176_v28 = vadd.f32 %v175_v25, %v79_v24 }
  0xef   :  { %v186_v31 = vmax.f32 %v176_v28, 0.0  ;;  %371 = vmatprep.subr.mxu1 %v187_v27 }
  0xf0   :  { %372 = vmatpush3.msra.mxu1 %v187_v27 }
  0xf1   :  { %373 = vmatprep.subr.mxu1 %v186_v31 }
  0xf2   :  { %374 = vmatpush3.msra.mxu1 %v186_v31 }
  0xf3   :  { %375 = vmatprep.subr.mxu1 %v185_v32 }
  0xf4   :  { %376 = vmatpush3.msra.mxu1 %v185_v32 }
  0xf5   :  { %377 = vmatprep.subr.mxu1 %v184_v33 }
  0xf6   :  { %378 = vmatpush3.msra.mxu1 %v184_v33 }
  0xf7   :  { %380 = vmatmul.mubr.msk.f32.vlgmr.msra.gmra.mxu1 %vm86_vm0, %v189_v34 }
 0x1b7   :  { %v381_v37 = vpop.f32.mrf.mxu1 }
 0x1b8   :  { %v280_v38 = vadd.f32 %v381_v37, %v200_v36 }
 0x1b9   :  { %v274_v39 = vpop.f32.mrf.mxu1 }
 0x1ba   :  { %v284_v40 = vmax.f32 %v280_v38, 0.0  ;;  %v275_v41 = vadd.f32 %v274_v39, %v195_v35 }
 0x1bc   :  { %v283_v42 = vmax.f32 %v275_v41, 0.0  ;;  %v298_v45 = vmul.f32 %v295_v44, %v284_v40 }
 0x1be   :  { %v297_v46 = vmul.f32 %v290_v43, %v283_v42 }
 0x1c0   :  { %v299_v47 = vadd.f32 %v298_v45, %v297_v46 }
 0x1c2   :  { %v300_v48 = vrot.slane %v299_v47, 4 }
 0x1c4   :  { %v301_v49 = vadd.f32 %v300_v48, %v299_v47 }
 0x1c6   :  { %v302_v50 = vrot.slane %v301_v49, 2 }
 0x1c8   :  { %v303_v51 = vadd.f32 %v302_v50, %v301_v49 }
 0x1ca   :  { %v304_v52 = vrot.slane %v303_v51, 1 }
 0x1cc   :  { %v305_v54 = vadd.f32 %v304_v52, %v303_v51 }
 0x1ce   :  { %v309_v56 = vadd.f32 %v308_v53, %v305_v54 }
 0x1d0   :  { %v311_v57 = vmul.f32 %v310_v55, %v309_v56 }
 0x1d2   :  { %v342_v58 = vmul.f32 -1.442695, %v311_v57 }
 0x1d4   :  { %390 = vpow2.f32 %v342_v58 }
 0x1e1   :  { %v391_v59 = vpop.eup %390 }
 0x1e2   :  { %v315_v60 = vadd.f32 1.0, %v391_v59 }
 0x1e4   :  { %392 = vrcp.f32 %v315_v60 }
 0x1f1   :  { %v393_v61 = vpop.eup %392 }
 0x1f2   :  { %318 = vst [vmem:[#allocation7] sm:$0x1] %v393_v61 }
 0x1f3   :  { %437 = shalt.err (!%p434_p0)
}
 0x1f4   :  { %328 = dma.vmem_to_hbm [thread:$0]  %s326_s17, 16, %s568_s7, [#allocation4]  }
 0x1f5   :  { %450 = dma.done.wait [#allocation4], 16  }
 0x1f6   :  { %451 = vsyncadd [#allocation4], 4294967280 }
 0x1f7   :  { %332 = vsyncpa [#allocation3], 1 }
 0x1f8   :  { %333 = vsyncpa [#allocation4], 1 }
 0x1f9   :  { %334 = vsyncpa [#allocation5], 1 }

</bundles_post_ra>
